<compile_context>
chip_gen: v5e
topology: v5e:2x2
jax: 0.10.0
libtpu: 0.0.40
codegen_flags: <defaults>
</compile_context>

<pallas_src>
import math

import jax
import jax.numpy as jnp
from jax import lax
from jax.experimental import pallas as pl
from jax.experimental.pallas import tpu as pltpu

# ----------------------------- small BERT config -----------------------------
HIDDEN = 32
NUM_HEADS = 4
HEAD_DIM = HIDDEN // NUM_HEADS
INTERMEDIATE = 64
NUM_LAYERS = 2
VOCAB = 100
MAX_POS = 64
TYPE_VOCAB = 2
NUM_CLASSES = 5          # len({'llama','human','gptneo','gpt3re','gpt2'})
LN_EPS = 1e-12
MASK_NEG = -1e9
ATTN_SCALE = 1.0 / math.sqrt(HEAD_DIM)


# --------------------------- in-kernel math helpers ---------------------------
def _layernorm(h, gamma, beta):
    mean = jnp.mean(h, axis=-1, keepdims=True)
    var = jnp.mean((h - mean) ** 2, axis=-1, keepdims=True)
    return (h - mean) * lax.rsqrt(var + LN_EPS) * gamma + beta


def _gelu(y):
    # TODO(synk): HF BERT uses exact erf-GELU; tanh approximation kept for
    # robust Mosaic (EUP tanh) lowering.
    c = math.sqrt(2.0 / math.pi)
    return 0.5 * y * (1.0 + jnp.tanh(c * (y + 0.044715 * y * y * y)))


# ------------------- kernel 1: embedding add + LayerNorm ----------------------
def _emb_ln_kernel(we_ref, pt_ref, g_ref, b_ref, o_ref):
    o_ref[...] = _layernorm(we_ref[...] + pt_ref[...], g_ref[...], b_ref[...])


def embedding_layernorm(word_emb, pos_type_emb, gamma, beta):
    B, S, H = word_emb.shape
    return pl.pallas_call(
        _emb_ln_kernel,
        out_shape=jax.ShapeDtypeStruct((B, S, H), jnp.float32),
        grid=(1,),
        in_specs=[
            pl.BlockSpec((B, S, H), lambda i: (0, 0, 0)),
            pl.BlockSpec((B, S, H), lambda i: (0, 0, 0)),
            pl.BlockSpec((1, 1, H), lambda i: (0, 0, 0)),
            pl.BlockSpec((1, 1, H), lambda i: (0, 0, 0)),
        ],
        out_specs=pl.BlockSpec((B, S, H), lambda i: (0, 0, 0)),
    )(word_emb, pos_type_emb, gamma.reshape(1, 1, H), beta.reshape(1, 1, H))


# --------------- kernel 2: one fully fused BERT encoder layer -----------------
def _encoder_layer_kernel(x_ref, bias_ref,
                          wqkv_ref, bqkv_ref,
                          wo_ref, bo_ref, ln1_g_ref, ln1_b_ref,
                          wi_ref, bi_ref, wo2_ref, bo2_ref,
                          ln2_g_ref, ln2_b_ref, o_ref):
    x = x_ref[0]             # (S, H)   one batch element per grid step
    bias = bias_ref[0]       # (1, S)   additive mask bias, broadcast over heads

    # ---- fused QKV projection: one MXU push (S,H)@(H,3H) ----
    qkv = jnp.dot(x, wqkv_ref[...], preferred_element_type=jnp.float32) + bqkv_ref[...]

    # ---- multi-head attention, all heads in this grid step ----
    # output projection is folded into the head loop:
    #   concat_h(ctx_h) @ Wo == sum_h ctx_h @ Wo[h*Dh:(h+1)*Dh, :]
    attn = jnp.zeros_like(x)
    for h in range(NUM_HEADS):                                   # static unroll
        q_h = qkv[:, h * HEAD_DIM:(h + 1) * HEAD_DIM]            # (S, Dh)
        k_h = qkv[:, HIDDEN + h * HEAD_DIM:HIDDEN + (h + 1) * HEAD_DIM]
        v_h = qkv[:, 2 * HIDDEN + h * HEAD_DIM:2 * HIDDEN + (h + 1) * HEAD_DIM]
        scores = lax.dot_general(
            q_h, k_h, (((1,), (1,)), ((), ())),
            preferred_element_type=jnp.float32) * ATTN_SCALE     # (S, S)
        scores = scores + bias
        scores = scores - jnp.max(scores, axis=-1, keepdims=True)
        p = jnp.exp(scores)
        # NOTE: a fully-masked row would give 1/0 here; BERT inputs always
        # attend to at least the [CLS] token, matching the reference module.
        p = p * pl.reciprocal(jnp.sum(p, axis=-1, keepdims=True), approx=True)
        ctx_h = jnp.dot(p, v_h, preferred_element_type=jnp.float32)   # (S, Dh)
        attn = attn + jnp.dot(ctx_h,
                              wo_ref[h * HEAD_DIM:(h + 1) * HEAD_DIM, :],
                              preferred_element_type=jnp.float32)
    attn = attn + bo_ref[...]

    # ---- residual + LayerNorm 1 ----
    h1 = _layernorm(attn + x, ln1_g_ref[...], ln1_b_ref[...])

    # ---- feed-forward (GELU) + residual + LayerNorm 2 ----
    inter = _gelu(jnp.dot(h1, wi_ref[...], preferred_element_type=jnp.float32)
                  + bi_ref[...])
    ffn = jnp.dot(inter, wo2_ref[...], preferred_element_type=jnp.float32) + bo2_ref[...]
    o_ref[0] = _layernorm(ffn + h1, ln2_g_ref[...], ln2_b_ref[...])


def encoder_layer(hidden, bias, layer):
    B, S, H = hidden.shape

    def w_full(shape):
        return pl.BlockSpec(shape, lambda b: (0, 0))

    return pl.pallas_call(
        _encoder_layer_kernel,
        out_shape=jax.ShapeDtypeStruct((B, S, H), jnp.float32),
        grid=(B,),
        in_specs=[
            pl.BlockSpec((1, S, H), lambda b: (b, 0, 0)),          # hidden
            pl.BlockSpec((1, 1, S), lambda b: (b, 0, 0)),          # mask bias
            w_full((H, 3 * H)), w_full((1, 3 * H)),                # wqkv, bqkv
            w_full((H, H)), w_full((1, H)),                        # wo, bo
            w_full((1, H)), w_full((1, H)),                        # ln1 gamma/beta
            w_full((H, INTERMEDIATE)), w_full((1, INTERMEDIATE)),  # wi, bi
            w_full((INTERMEDIATE, H)), w_full((1, H)),             # wo2, bo2
            w_full((1, H)), w_full((1, H)),                        # ln2 gamma/beta
        ],
        out_specs=pl.BlockSpec((1, S, H), lambda b: (b, 0, 0)),
        compiler_params=pltpu.CompilerParams(dimension_semantics=("parallel",)),
    )(hidden, bias,
      layer["wqkv"], layer["bqkv"].reshape(1, -1),
      layer["wo"], layer["bo"].reshape(1, -1),
      layer["ln1_g"].reshape(1, -1), layer["ln1_b"].reshape(1, -1),
      layer["wi"], layer["bi"].reshape(1, -1),
      layer["wo2"], layer["bo2"].reshape(1, -1),
      layer["ln2_g"].reshape(1, -1), layer["ln2_b"].reshape(1, -1))


# ------------------------------ parameter setup -------------------------------
def _dense(key, din, dout, scale=0.02):
    w = jax.random.normal(key, (din, dout), jnp.float32) * scale
    b = jnp.zeros((dout,), jnp.float32)
    return w, b


def init_params(key):
    keys = iter(jax.random.split(key, 64))
    p = {
        "word_emb": jax.random.normal(next(keys), (VOCAB, HIDDEN), jnp.float32) * 0.02,
        "pos_emb": jax.random.normal(next(keys), (MAX_POS, HIDDEN), jnp.float32) * 0.02,
        "type_emb": jax.random.normal(next(keys), (TYPE_VOCAB, HIDDEN), jnp.float32) * 0.02,
        "emb_ln_g": jnp.ones((HIDDEN,), jnp.float32),
        "emb_ln_b": jnp.zeros((HIDDEN,), jnp.float32),
        "layers": [],
    }
    for _ in range(NUM_LAYERS):
        layer = {}
        # fused QKV weight (wq|wk|wv along the output axis) -> one matmul in-kernel
        layer["wqkv"], layer["bqkv"] = _dense(next(keys), HIDDEN, 3 * HIDDEN)
        layer["wo"], layer["bo"] = _dense(next(keys), HIDDEN, HIDDEN)
        layer["ln1_g"] = jnp.ones((HIDDEN,), jnp.float32)
        layer["ln1_b"] = jnp.zeros((HIDDEN,), jnp.float32)
        layer["wi"], layer["bi"] = _dense(next(keys), HIDDEN, INTERMEDIATE)
        layer["wo2"], layer["bo2"] = _dense(next(keys), INTERMEDIATE, HIDDEN)
        layer["ln2_g"] = jnp.ones((HIDDEN,), jnp.float32)
        layer["ln2_b"] = jnp.zeros((HIDDEN,), jnp.float32)
        p["layers"].append(layer)
    p["wp"], p["bp"] = _dense(next(keys), HIDDEN, HIDDEN)          # pooler dense
    p["wfc"], p["bfc"] = _dense(next(keys), HIDDEN, NUM_CLASSES)   # self.fc
    return p


# --------------------------------- forward ------------------------------------
def aigt_classifier_forward(params, input_ids, attention_mask):
    B, S = input_ids.shape
    assert S <= MAX_POS, "sequence length exceeds position-embedding table"

    # --- embeddings (gather is plain-JAX glue; add+LN is one Pallas call) ---
    we = jnp.take(params["word_emb"], input_ids, axis=0)                 # (B,S,H)
    pe = params["pos_emb"][:S][None, :, :]                               # (1,S,H)
    te = params["type_emb"][0][None, None, :]                            # token_type_ids == 0
    pos_type = jnp.broadcast_to(pe + te, (B, S, HIDDEN))
    hidden = embedding_layernorm(we, pos_type,
                                 params["emb_ln_g"], params["emb_ln_b"])
    # dropout is a no-op in eval mode.

    # --- attention mask -> single additive bias per batch (no per-head repeat) ---
    bias = ((1.0 - attention_mask.astype(jnp.float32)) * MASK_NEG)[:, None, :]  # (B,1,S)

    # --- transformer encoder: one fused Pallas kernel per layer ---
    for layer in params["layers"]:
        hidden = encoder_layer(hidden, bias, layer)

    # --- pooler + classification head: (B,32)/(B,5) are sub-tile -> plain JAX ---
    first_tok = hidden[:, 0, :]                                          # (B,H)
    pooled = jnp.tanh(first_tok @ params["wp"] + params["bp"])
    logits = pooled @ params["wfc"] + params["bfc"]                      # (B,5)
    return logits


# ----------------------------------- main --------------------------------------
if __name__ == "__main__":
    B, S = 2, 8
    key = jax.random.PRNGKey(0)
    k_ids, k_params = jax.random.split(key)

    input_ids = jax.random.randint(k_ids, (B, S), 0, VOCAB, dtype=jnp.int32)
    attention_mask = jnp.ones((B, S), dtype=jnp.int32)
    params = init_params(k_params)

    fwd = jax.jit(aigt_classifier_forward)
    logits = jax.block_until_ready(fwd(params, input_ids, attention_mask))
    assert logits.shape == (B, NUM_CLASSES)
    assert bool(jnp.all(jnp.isfinite(logits)))
    print("KERNEL_OK")
</pallas_src>

<mosaic_0001>
module attributes {stable_mosaic.version = 11 : i64} {
  func.func @_emb_ln_kernel(%arg0: i32, %arg1: memref<2x8x32xf32, #tpu.memory_space<vmem>>, %arg2: memref<2x8x32xf32, #tpu.memory_space<vmem>>, %arg3: memref<1x1x32xf32, #tpu.memory_space<vmem>>, %arg4: memref<1x1x32xf32, #tpu.memory_space<vmem>>, %arg5: memref<2x8x32xf32, #tpu.memory_space<vmem>>) attributes {dimension_semantics = [#tpu.dimension_semantics<arbitrary>], iteration_bounds = array<i64: 1>, scalar_prefetch = 0 : i64, scratch_operands = 0 : i64, tpu.core_type = #tpu.core_type<tc>, window_params = [{pipeline_mode = #tpu.pipeline_mode<synchronous>, transform_indices = @transform_0, window_bounds = array<i64: 2, 8, 32>}, {pipeline_mode = #tpu.pipeline_mode<synchronous>, transform_indices = @transform_1, window_bounds = array<i64: 2, 8, 32>}, {pipeline_mode = #tpu.pipeline_mode<synchronous>, transform_indices = @transform_2, window_bounds = array<i64: 1, 1, 32>}, {pipeline_mode = #tpu.pipeline_mode<synchronous>, transform_indices = @transform_3, window_bounds = array<i64: 1, 1, 32>}, {pipeline_mode = #tpu.pipeline_mode<synchronous>, transform_indices = @transform_4, window_bounds = array<i64: 2, 8, 32>}]} {
    %c0 = arith.constant 0 : index
    %c0_0 = arith.constant 0 : index
    %c0_1 = arith.constant 0 : index
    %0 = vector.load %arg1[%c0, %c0_0, %c0_1] : memref<2x8x32xf32, #tpu.memory_space<vmem>>, vector<2x8x32xf32>
    %c0_2 = arith.constant 0 : index
    %c0_3 = arith.constant 0 : index
    %c0_4 = arith.constant 0 : index
    %1 = vector.load %arg2[%c0_2, %c0_3, %c0_4] : memref<2x8x32xf32, #tpu.memory_space<vmem>>, vector<2x8x32xf32>
    %2 = arith.addf %0, %1 : vector<2x8x32xf32>
    %c0_5 = arith.constant 0 : index
    %c0_6 = arith.constant 0 : index
    %c0_7 = arith.constant 0 : index
    %3 = vector.load %arg3[%c0_5, %c0_6, %c0_7] : memref<1x1x32xf32, #tpu.memory_space<vmem>>, vector<1x1x32xf32>
    %c0_8 = arith.constant 0 : index
    %c0_9 = arith.constant 0 : index
    %c0_10 = arith.constant 0 : index
    %4 = vector.load %arg4[%c0_8, %c0_9, %c0_10] : memref<1x1x32xf32, #tpu.memory_space<vmem>>, vector<1x1x32xf32>
    %cst = arith.constant dense<0.000000e+00> : vector<2x8xf32>
    %5 = vector.multi_reduction <add>, %2, %cst [2] : vector<2x8x32xf32> to vector<2x8xf32>
    %6 = vector.shape_cast %5 : vector<2x8xf32> to vector<2x8x1xf32>
    %cst_11 = arith.constant 3.200000e+01 : f32
    %7 = vector.broadcast %cst_11 : f32 to vector<2x8x1xf32>
    %8 = arith.divf %6, %7 : vector<2x8x1xf32>
    %9 = vector.broadcast %8 : vector<2x8x1xf32> to vector<2x8x32xf32>
    %10 = arith.subf %2, %9 : vector<2x8x32xf32>
    %11 = arith.mulf %10, %10 : vector<2x8x32xf32>
    %cst_12 = arith.constant dense<0.000000e+00> : vector<2x8xf32>
    %12 = vector.multi_reduction <add>, %11, %cst_12 [2] : vector<2x8x32xf32> to vector<2x8xf32>
    %13 = vector.shape_cast %12 : vector<2x8xf32> to vector<2x8x1xf32>
    %cst_13 = arith.constant 3.200000e+01 : f32
    %14 = vector.broadcast %cst_13 : f32 to vector<2x8x1xf32>
    %15 = arith.divf %13, %14 : vector<2x8x1xf32>
    %16 = vector.broadcast %8 : vector<2x8x1xf32> to vector<2x8x32xf32>
    %17 = arith.subf %2, %16 : vector<2x8x32xf32>
    %cst_14 = arith.constant 9.99999996E-13 : f32
    %18 = vector.broadcast %cst_14 : f32 to vector<2x8x1xf32>
    %19 = arith.addf %15, %18 : vector<2x8x1xf32>
    %20 = math.rsqrt %19 : vector<2x8x1xf32>
    %21 = vector.broadcast %20 : vector<2x8x1xf32> to vector<2x8x32xf32>
    %22 = arith.mulf %17, %21 : vector<2x8x32xf32>
    %23 = vector.broadcast %3 : vector<1x1x32xf32> to vector<2x8x32xf32>
    %24 = arith.mulf %22, %23 : vector<2x8x32xf32>
    %25 = vector.broadcast %4 : vector<1x1x32xf32> to vector<2x8x32xf32>
    %26 = arith.addf %24, %25 : vector<2x8x32xf32>
    %c0_15 = arith.constant 0 : index
    %c0_16 = arith.constant 0 : index
    %c0_17 = arith.constant 0 : index
    %27 = vector.load %arg5[%c0_15, %c0_16, %c0_17] : memref<2x8x32xf32, #tpu.memory_space<vmem>>, vector<2x8x32xf32>
    tpu.vector_store %arg5[%c0_15, %c0_16, %c0_17], %26 {strides = array<i32>} : memref<2x8x32xf32, #tpu.memory_space<vmem>>, vector<2x8x32xf32>,
    return
  }
  func.func @transform_0(%arg0: i32) -> (i32, i32, i32) {
    %c0_i32 = arith.constant 0 : i32
    %c0_i32_0 = arith.constant 0 : i32
    %c0_i32_1 = arith.constant 0 : i32
    %c0_i32_2 = arith.constant 0 : i32
    return %c0_i32, %c0_i32_0, %c0_i32_1 : i32, i32, i32
  }
  func.func @transform_1(%arg0: i32) -> (i32, i32, i32) {
    %c0_i32 = arith.constant 0 : i32
    %c0_i32_0 = arith.constant 0 : i32
    %c0_i32_1 = arith.constant 0 : i32
    %c0_i32_2 = arith.constant 0 : i32
    return %c0_i32, %c0_i32_0, %c0_i32_1 : i32, i32, i32
  }
  func.func @transform_2(%arg0: i32) -> (i32, i32, i32) {
    %c0_i32 = arith.constant 0 : i32
    %c0_i32_0 = arith.constant 0 : i32
    %c0_i32_1 = arith.constant 0 : i32
    %c0_i32_2 = arith.constant 0 : i32
    return %c0_i32, %c0_i32_0, %c0_i32_1 : i32, i32, i32
  }
  func.func @transform_3(%arg0: i32) -> (i32, i32, i32) {
    %c0_i32 = arith.constant 0 : i32
    %c0_i32_0 = arith.constant 0 : i32
    %c0_i32_1 = arith.constant 0 : i32
    %c0_i32_2 = arith.constant 0 : i32
    return %c0_i32, %c0_i32_0, %c0_i32_1 : i32, i32, i32
  }
  func.func @transform_4(%arg0: i32) -> (i32, i32, i32) {
    %c0_i32 = arith.constant 0 : i32
    %c0_i32_0 = arith.constant 0 : i32
    %c0_i32_1 = arith.constant 0 : i32
    %c0_i32_2 = arith.constant 0 : i32
    return %c0_i32, %c0_i32_0, %c0_i32_1 : i32, i32, i32
  }
}

module attributes {stable_mosaic.version = 11 : i64} {
  func.func @_encoder_layer_kernel(%arg0: i32, %arg1: memref<1x8x32xf32, #tpu.memory_space<vmem>>, %arg2: memref<1x1x8xf32, #tpu.memory_space<vmem>>, %arg3: memref<32x96xf32, #tpu.memory_space<vmem>>, %arg4: memref<1x96xf32, #tpu.memory_space<vmem>>, %arg5: memref<32x32xf32, #tpu.memory_space<vmem>>, %arg6: memref<1x32xf32, #tpu.memory_space<vmem>>, %arg7: memref<1x32xf32, #tpu.memory_space<vmem>>, %arg8: memref<1x32xf32, #tpu.memory_space<vmem>>, %arg9: memref<32x64xf32, #tpu.memory_space<vmem>>, %arg10: memref<1x64xf32, #tpu.memory_space<vmem>>, %arg11: memref<64x32xf32, #tpu.memory_space<vmem>>, %arg12: memref<1x32xf32, #tpu.memory_space<vmem>>, %arg13: memref<1x32xf32, #tpu.memory_space<vmem>>, %arg14: memref<1x32xf32, #tpu.memory_space<vmem>>, %arg15: memref<1x8x32xf32, #tpu.memory_space<vmem>>) attributes {dimension_semantics = [#tpu.dimension_semantics<parallel>], iteration_bounds = array<i64: 2>, scalar_prefetch = 0 : i64, scratch_operands = 0 : i64, tpu.core_type = #tpu.core_type<tc>, window_params = [{transform_indices = @transform_0, window_bounds = array<i64: 1, 8, 32>}, {transform_indices = @transform_1, window_bounds = array<i64: 1, 1, 8>}, {pipeline_mode = #tpu.pipeline_mode<synchronous>, transform_indices = @transform_2, window_bounds = array<i64: 32, 96>}, {pipeline_mode = #tpu.pipeline_mode<synchronous>, transform_indices = @transform_3, window_bounds = array<i64: 1, 96>}, {pipeline_mode = #tpu.pipeline_mode<synchronous>, transform_indices = @transform_4, window_bounds = array<i64: 32, 32>}, {pipeline_mode = #tpu.pipeline_mode<synchronous>, transform_indices = @transform_5, window_bounds = array<i64: 1, 32>}, {pipeline_mode = #tpu.pipeline_mode<synchronous>, transform_indices = @transform_6, window_bounds = array<i64: 1, 32>}, {pipeline_mode = #tpu.pipeline_mode<synchronous>, transform_indices = @transform_7, window_bounds = array<i64: 1, 32>}, {pipeline_mode = #tpu.pipeline_mode<synchronous>, transform_indices = @transform_8, window_bounds = array<i64: 32, 64>}, {pipeline_mode = #tpu.pipeline_mode<synchronous>, transform_indices = @transform_9, window_bounds = array<i64: 1, 64>}, {pipeline_mode = #tpu.pipeline_mode<synchronous>, transform_indices = @transform_10, window_bounds = array<i64: 64, 32>}, {pipeline_mode = #tpu.pipeline_mode<synchronous>, transform_indices = @transform_11, window_bounds = array<i64: 1, 32>}, {pipeline_mode = #tpu.pipeline_mode<synchronous>, transform_indices = @transform_12, window_bounds = array<i64: 1, 32>}, {pipeline_mode = #tpu.pipeline_mode<synchronous>, transform_indices = @transform_13, window_bounds = array<i64: 1, 32>}, {transform_indices = @transform_14, window_bounds = array<i64: 1, 8, 32>}]} {
    %c0 = arith.constant 0 : index
    %c0_0 = arith.constant 0 : index
    %c0_1 = arith.constant 0 : index
    %0 = vector.load %arg1[%c0, %c0_0, %c0_1] : memref<1x8x32xf32, #tpu.memory_space<vmem>>, vector<1x8x32xf32>
    %1 = vector.shape_cast %0 : vector<1x8x32xf32> to vector<8x32xf32>
    %c0_2 = arith.constant 0 : index
    %c0_3 = arith.constant 0 : index
    %c0_4 = arith.constant 0 : index
    %2 = vector.load %arg2[%c0_2, %c0_3, %c0_4] : memref<1x1x8xf32, #tpu.memory_space<vmem>>, vector<1x1x8xf32>
    %3 = vector.shape_cast %2 : vector<1x1x8xf32> to vector<1x8xf32>
    %c0_5 = arith.constant 0 : index
    %c0_6 = arith.constant 0 : index
    %4 = vector.load %arg3[%c0_5, %c0_6] : memref<32x96xf32, #tpu.memory_space<vmem>>, vector<32x96xf32>
    %cst = arith.constant dense<0.000000e+00> : vector<8x96xf32>
    %5 = tpu.matmul %1, %4, %cst {dimension_numbers = #tpu.dot_dimension_numbers<[1], [0], [0], [1], [0, 0, 1, 1], [], []>} : vector<8x32xf32>, vector<32x96xf32>, vector<8x96xf32> -> vector<8x96xf32>
    %c0_7 = arith.constant 0 : index
    %c0_8 = arith.constant 0 : index
    %6 = vector.load %arg4[%c0_7, %c0_8] : memref<1x96xf32, #tpu.memory_space<vmem>>, vector<1x96xf32>
    %7 = vector.broadcast %6 : vector<1x96xf32> to vector<8x96xf32>
    %8 = arith.addf %5, %7 : vector<8x96xf32>
    %cst_9 = arith.constant 0.000000e+00 : f32
    %9 = vector.broadcast %cst_9 : f32 to vector<8x32xf32>
    %10 = vector.extract_strided_slice %8 {offsets = [0, 0], sizes = [8, 8], strides = [1, 1]} : vector<8x96xf32> to vector<8x8xf32>
    %11 = vector.extract_strided_slice %8 {offsets = [0, 32], sizes = [8, 8], strides = [1, 1]} : vector<8x96xf32> to vector<8x8xf32>
    %12 = vector.extract_strided_slice %8 {offsets = [0, 64], sizes = [8, 8], strides = [1, 1]} : vector<8x96xf32> to vector<8x8xf32>
    %cst_10 = arith.constant dense<0.000000e+00> : vector<8x8xf32>
    %13 = tpu.matmul %10, %11, %cst_10 {dimension_numbers = #tpu.dot_dimension_numbers<[1], [1], [0], [0], [0, 0, 1, 0], [], []>} : vector<8x8xf32>, vector<8x8xf32>, vector<8x8xf32> -> vector<8x8xf32>
    %cst_11 = arith.constant 0.353553385 : f32
    %14 = vector.broadcast %cst_11 : f32 to vector<8x8xf32>
    %15 = arith.mulf %13, %14 : vector<8x8xf32>
    %16 = vector.broadcast %3 : vector<1x8xf32> to vector<8x8xf32>
    %17 = arith.addf %15, %16 : vector<8x8xf32>
    %cst_12 = arith.constant dense<0xFF800000> : vector<8xf32>
    %18 = vector.multi_reduction <maximumf>, %17, %cst_12 [1] : vector<8x8xf32> to vector<8xf32>
    %19 = vector.shape_cast %18 : vector<8xf32> to vector<8x1xf32>
    %20 = vector.broadcast %19 : vector<8x1xf32> to vector<8x8xf32>
    %21 = arith.subf %17, %20 : vector<8x8xf32>
    %22 = math.exp %21 : vector<8x8xf32>
    %cst_13 = arith.constant dense<0.000000e+00> : vector<8xf32>
    %23 = vector.multi_reduction <add>, %22, %cst_13 [1] : vector<8x8xf32> to vector<8xf32>
    %24 = vector.shape_cast %23 : vector<8xf32> to vector<8x1xf32>
    %25 = tpu.reciprocal %24 {approx = true} : vector<8x1xf32> -> vector<8x1xf32>
    %26 = vector.broadcast %25 : vector<8x1xf32> to vector<8x8xf32>
    %27 = arith.mulf %22, %26 : vector<8x8xf32>
    %cst_14 = arith.constant dense<0.000000e+00> : vector<8x8xf32>
    %28 = tpu.matmul %27, %12, %cst_14 {dimension_numbers = #tpu.dot_dimension_numbers<[1], [0], [0], [1], [0, 0, 1, 1], [], []>} : vector<8x8xf32>, vector<8x8xf32>, vector<8x8xf32> -> vector<8x8xf32>
    %c0_15 = arith.constant 0 : index
    %c0_16 = arith.constant 0 : index
    %29 = vector.load %arg5[%c0_15, %c0_16] : memref<32x32xf32, #tpu.memory_space<vmem>>, vector<8x32xf32>
    %cst_17 = arith.constant dense<0.000000e+00> : vector<8x32xf32>
    %30 = tpu.matmul %28, %29, %cst_17 {dimension_numbers = #tpu.dot_dimension_numbers<[1], [0], [0], [1], [0, 0, 1, 1], [], []>} : vector<8x8xf32>, vector<8x32xf32>, vector<8x32xf32> -> vector<8x32xf32>
    %31 = arith.addf %9, %30 : vector<8x32xf32>
    %32 = vector.extract_strided_slice %8 {offsets = [0, 8], sizes = [8, 8], strides = [1, 1]} : vector<8x96xf32> to vector<8x8xf32>
    %33 = vector.extract_strided_slice %8 {offsets = [0, 40], sizes = [8, 8], strides = [1, 1]} : vector<8x96xf32> to vector<8x8xf32>
    %34 = vector.extract_strided_slice %8 {offsets = [0, 72], sizes = [8, 8], strides = [1, 1]} : vector<8x96xf32> to vector<8x8xf32>
    %cst_18 = arith.constant dense<0.000000e+00> : vector<8x8xf32>
    %35 = tpu.matmul %32, %33, %cst_18 {dimension_numbers = #tpu.dot_dimension_numbers<[1], [1], [0], [0], [0, 0, 1, 0], [], []>} : vector<8x8xf32>, vector<8x8xf32>, vector<8x8xf32> -> vector<8x8xf32>
    %cst_19 = arith.constant 0.353553385 : f32
    %36 = vector.broadcast %cst_19 : f32 to vector<8x8xf32>
    %37 = arith.mulf %35, %36 : vector<8x8xf32>
    %38 = vector.broadcast %3 : vector<1x8xf32> to vector<8x8xf32>
    %39 = arith.addf %37, %38 : vector<8x8xf32>
    %cst_20 = arith.constant dense<0xFF800000> : vector<8xf32>
    %40 = vector.multi_reduction <maximumf>, %39, %cst_20 [1] : vector<8x8xf32> to vector<8xf32>
    %41 = vector.shape_cast %40 : vector<8xf32> to vector<8x1xf32>
    %42 = vector.broadcast %41 : vector<8x1xf32> to vector<8x8xf32>
    %43 = arith.subf %39, %42 : vector<8x8xf32>
    %44 = math.exp %43 : vector<8x8xf32>
    %cst_21 = arith.constant dense<0.000000e+00> : vector<8xf32>
    %45 = vector.multi_reduction <add>, %44, %cst_21 [1] : vector<8x8xf32> to vector<8xf32>
    %46 = vector.shape_cast %45 : vector<8xf32> to vector<8x1xf32>
    %47 = tpu.reciprocal %46 {approx = true} : vector<8x1xf32> -> vector<8x1xf32>
    %48 = vector.broadcast %47 : vector<8x1xf32> to vector<8x8xf32>
    %49 = arith.mulf %44, %48 : vector<8x8xf32>
    %cst_22 = arith.constant dense<0.000000e+00> : vector<8x8xf32>
    %50 = tpu.matmul %49, %34, %cst_22 {dimension_numbers = #tpu.dot_dimension_numbers<[1], [0], [0], [1], [0, 0, 1, 1], [], []>} : vector<8x8xf32>, vector<8x8xf32>, vector<8x8xf32> -> vector<8x8xf32>
    %c8 = arith.constant 8 : index
    %c0_23 = arith.constant 0 : index
    %51 = vector.load %arg5[%c8, %c0_23] : memref<32x32xf32, #tpu.memory_space<vmem>>, vector<8x32xf32>
    %cst_24 = arith.constant dense<0.000000e+00> : vector<8x32xf32>
    %52 = tpu.matmul %50, %51, %cst_24 {dimension_numbers = #tpu.dot_dimension_numbers<[1], [0], [0], [1], [0, 0, 1, 1], [], []>} : vector<8x8xf32>, vector<8x32xf32>, vector<8x32xf32> -> vector<8x32xf32>
    %53 = arith.addf %31, %52 : vector<8x32xf32>
    %54 = vector.extract_strided_slice %8 {offsets = [0, 16], sizes = [8, 8], strides = [1, 1]} : vector<8x96xf32> to vector<8x8xf32>
    %55 = vector.extract_strided_slice %8 {offsets = [0, 48], sizes = [8, 8], strides = [1, 1]} : vector<8x96xf32> to vector<8x8xf32>
    %56 = vector.extract_strided_slice %8 {offsets = [0, 80], sizes = [8, 8], strides = [1, 1]} : vector<8x96xf32> to vector<8x8xf32>
    %cst_25 = arith.constant dense<0.000000e+00> : vector<8x8xf32>
    %57 = tpu.matmul %54, %55, %cst_25 {dimension_numbers = #tpu.dot_dimension_numbers<[1], [1], [0], [0], [0, 0, 1, 0], [], []>} : vector<8x8xf32>, vector<8x8xf32>, vector<8x8xf32> -> vector<8x8xf32>
    %cst_26 = arith.constant 0.353553385 : f32
    %58 = vector.broadcast %cst_26 : f32 to vector<8x8xf32>
    %59 = arith.mulf %57, %58 : vector<8x8xf32>
    %60 = vector.broadcast %3 : vector<1x8xf32> to vector<8x8xf32>
    %61 = arith.addf %59, %60 : vector<8x8xf32>
    %cst_27 = arith.constant dense<0xFF800000> : vector<8xf32>
    %62 = vector.multi_reduction <maximumf>, %61, %cst_27 [1] : vector<8x8xf32> to vector<8xf32>
    %63 = vector.shape_cast %62 : vector<8xf32> to vector<8x1xf32>
    %64 = vector.broadcast %63 : vector<8x1xf32> to vector<8x8xf32>
    %65 = arith.subf %61, %64 : vector<8x8xf32>
    %66 = math.exp %65 : vector<8x8xf32>
    %cst_28 = arith.constant dense<0.000000e+00> : vector<8xf32>
    %67 = vector.multi_reduction <add>, %66, %cst_28 [1] : vector<8x8xf32> to vector<8xf32>
    %68 = vector.shape_cast %67 : vector<8xf32> to vector<8x1xf32>
    %69 = tpu.reciprocal %68 {approx = true} : vector<8x1xf32> -> vector<8x1xf32>
    %70 = vector.broadcast %69 : vector<8x1xf32> to vector<8x8xf32>
    %71 = arith.mulf %66, %70 : vector<8x8xf32>
    %cst_29 = arith.constant dense<0.000000e+00> : vector<8x8xf32>
    %72 = tpu.matmul %71, %56, %cst_29 {dimension_numbers = #tpu.dot_dimension_numbers<[1], [0], [0], [1], [0, 0, 1, 1], [], []>} : vector<8x8xf32>, vector<8x8xf32>, vector<8x8xf32> -> vector<8x8xf32>
    %c16 = arith.constant 16 : index
    %c0_30 = arith.constant 0 : index
    %73 = vector.load %arg5[%c16, %c0_30] : memref<32x32xf32, #tpu.memory_space<vmem>>, vector<8x32xf32>
    %cst_31 = arith.constant dense<0.000000e+00> : vector<8x32xf32>
    %74 = tpu.matmul %72, %73, %cst_31 {dimension_numbers = #tpu.dot_dimension_numbers<[1], [0], [0], [1], [0, 0, 1, 1], [], []>} : vector<8x8xf32>, vector<8x32xf32>, vector<8x32xf32> -> vector<8x32xf32>
    %75 = arith.addf %53, %74 : vector<8x32xf32>
    %76 = vector.extract_strided_slice %8 {offsets = [0, 24], sizes = [8, 8], strides = [1, 1]} : vector<8x96xf32> to vector<8x8xf32>
    %77 = vector.extract_strided_slice %8 {offsets = [0, 56], sizes = [8, 8], strides = [1, 1]} : vector<8x96xf32> to vector<8x8xf32>
    %78 = vector.extract_strided_slice %8 {offsets = [0, 88], sizes = [8, 8], strides = [1, 1]} : vector<8x96xf32> to vector<8x8xf32>
    %cst_32 = arith.constant dense<0.000000e+00> : vector<8x8xf32>
    %79 = tpu.matmul %76, %77, %cst_32 {dimension_numbers = #tpu.dot_dimension_numbers<[1], [1], [0], [0], [0, 0, 1, 0], [], []>} : vector<8x8xf32>, vector<8x8xf32>, vector<8x8xf32> -> vector<8x8xf32>
    %cst_33 = arith.constant 0.353553385 : f32
    %80 = vector.broadcast %cst_33 : f32 to vector<8x8xf32>
    %81 = arith.mulf %79, %80 : vector<8x8xf32>
    %82 = vector.broadcast %3 : vector<1x8xf32> to vector<8x8xf32>
    %83 = arith.addf %81, %82 : vector<8x8xf32>
    %cst_34 = arith.constant dense<0xFF800000> : vector<8xf32>
    %84 = vector.multi_reduction <maximumf>, %83, %cst_34 [1] : vector<8x8xf32> to vector<8xf32>
    %85 = vector.shape_cast %84 : vector<8xf32> to vector<8x1xf32>
    %86 = vector.broadcast %85 : vector<8x1xf32> to vector<8x8xf32>
    %87 = arith.subf %83, %86 : vector<8x8xf32>
    %88 = math.exp %87 : vector<8x8xf32>
    %cst_35 = arith.constant dense<0.000000e+00> : vector<8xf32>
    %89 = vector.multi_reduction <add>, %88, %cst_35 [1] : vector<8x8xf32> to vector<8xf32>
    %90 = vector.shape_cast %89 : vector<8xf32> to vector<8x1xf32>
    %91 = tpu.reciprocal %90 {approx = true} : vector<8x1xf32> -> vector<8x1xf32>
    %92 = vector.broadcast %91 : vector<8x1xf32> to vector<8x8xf32>
    %93 = arith.mulf %88, %92 : vector<8x8xf32>
    %cst_36 = arith.constant dense<0.000000e+00> : vector<8x8xf32>
    %94 = tpu.matmul %93, %78, %cst_36 {dimension_numbers = #tpu.dot_dimension_numbers<[1], [0], [0], [1], [0, 0, 1, 1], [], []>} : vector<8x8xf32>, vector<8x8xf32>, vector<8x8xf32> -> vector<8x8xf32>
    %c24 = arith.constant 24 : index
    %c0_37 = arith.constant 0 : index
    %95 = vector.load %arg5[%c24, %c0_37] : memref<32x32xf32, #tpu.memory_space<vmem>>, vector<8x32xf32>
    %cst_38 = arith.constant dense<0.000000e+00> : vector<8x32xf32>
    %96 = tpu.matmul %94, %95, %cst_38 {dimension_numbers = #tpu.dot_dimension_numbers<[1], [0], [0], [1], [0, 0, 1, 1], [], []>} : vector<8x8xf32>, vector<8x32xf32>, vector<8x32xf32> -> vector<8x32xf32>
    %97 = arith.addf %75, %96 : vector<8x32xf32>
    %c0_39 = arith.constant 0 : index
    %c0_40 = arith.constant 0 : index
    %98 = vector.load %arg6[%c0_39, %c0_40] : memref<1x32xf32, #tpu.memory_space<vmem>>, vector<1x32xf32>
    %99 = vector.broadcast %98 : vector<1x32xf32> to vector<8x32xf32>
    %100 = arith.addf %97, %99 : vector<8x32xf32>
    %101 = arith.addf %100, %1 : vector<8x32xf32>
    %c0_41 = arith.constant 0 : index
    %c0_42 = arith.constant 0 : index
    %102 = vector.load %arg7[%c0_41, %c0_42] : memref<1x32xf32, #tpu.memory_space<vmem>>, vector<1x32xf32>
    %c0_43 = arith.constant 0 : index
    %c0_44 = arith.constant 0 : index
    %103 = vector.load %arg8[%c0_43, %c0_44] : memref<1x32xf32, #tpu.memory_space<vmem>>, vector<1x32xf32>
    %cst_45 = arith.constant dense<0.000000e+00> : vector<8xf32>
    %104 = vector.multi_reduction <add>, %101, %cst_45 [1] : vector<8x32xf32> to vector<8xf32>
    %105 = vector.shape_cast %104 : vector<8xf32> to vector<8x1xf32>
    %cst_46 = arith.constant 3.200000e+01 : f32
    %106 = vector.broadcast %cst_46 : f32 to vector<8x1xf32>
    %107 = arith.divf %105, %106 : vector<8x1xf32>
    %108 = vector.broadcast %107 : vector<8x1xf32> to vector<8x32xf32>
    %109 = arith.subf %101, %108 : vector<8x32xf32>
    %110 = arith.mulf %109, %109 : vector<8x32xf32>
    %cst_47 = arith.constant dense<0.000000e+00> : vector<8xf32>
    %111 = vector.multi_reduction <add>, %110, %cst_47 [1] : vector<8x32xf32> to vector<8xf32>
    %112 = vector.shape_cast %111 : vector<8xf32> to vector<8x1xf32>
    %cst_48 = arith.constant 3.200000e+01 : f32
    %113 = vector.broadcast %cst_48 : f32 to vector<8x1xf32>
    %114 = arith.divf %112, %113 : vector<8x1xf32>
    %115 = vector.broadcast %107 : vector<8x1xf32> to vector<8x32xf32>
    %116 = arith.subf %101, %115 : vector<8x32xf32>
    %cst_49 = arith.constant 9.99999996E-13 : f32
    %117 = vector.broadcast %cst_49 : f32 to vector<8x1xf32>
    %118 = arith.addf %114, %117 : vector<8x1xf32>
    %119 = math.rsqrt %118 : vector<8x1xf32>
    %120 = vector.broadcast %119 : vector<8x1xf32> to vector<8x32xf32>
    %121 = arith.mulf %116, %120 : vector<8x32xf32>
    %122 = vector.broadcast %102 : vector<1x32xf32> to vector<8x32xf32>
    %123 = arith.mulf %121, %122 : vector<8x32xf32>
    %124 = vector.broadcast %103 : vector<1x32xf32> to vector<8x32xf32>
    %125 = arith.addf %123, %124 : vector<8x32xf32>
    %c0_50 = arith.constant 0 : index
    %c0_51 = arith.constant 0 : index
    %126 = vector.load %arg9[%c0_50, %c0_51] : memref<32x64xf32, #tpu.memory_space<vmem>>, vector<32x64xf32>
    %cst_52 = arith.constant dense<0.000000e+00> : vector<8x64xf32>
    %127 = tpu.matmul %125, %126, %cst_52 {dimension_numbers = #tpu.dot_dimension_numbers<[1], [0], [0], [1], [0, 0, 1, 1], [], []>} : vector<8x32xf32>, vector<32x64xf32>, vector<8x64xf32> -> vector<8x64xf32>
    %c0_53 = arith.constant 0 : index
    %c0_54 = arith.constant 0 : index
    %128 = vector.load %arg10[%c0_53, %c0_54] : memref<1x64xf32, #tpu.memory_space<vmem>>, vector<1x64xf32>
    %129 = vector.broadcast %128 : vector<1x64xf32> to vector<8x64xf32>
    %130 = arith.addf %127, %129 : vector<8x64xf32>
    %cst_55 = arith.constant 5.000000e-01 : f32
    %131 = vector.broadcast %cst_55 : f32 to vector<8x64xf32>
    %132 = arith.mulf %131, %130 : vector<8x64xf32>
    %cst_56 = arith.constant 4.471500e-02 : f32
    %133 = vector.broadcast %cst_56 : f32 to vector<8x64xf32>
    %134 = arith.mulf %133, %130 : vector<8x64xf32>
    %135 = arith.mulf %134, %130 : vector<8x64xf32>
    %136 = arith.mulf %135, %130 : vector<8x64xf32>
    %137 = arith.addf %130, %136 : vector<8x64xf32>
    %cst_57 = arith.constant 0.797884583 : f32
    %138 = vector.broadcast %cst_57 : f32 to vector<8x64xf32>
    %139 = arith.mulf %138, %137 : vector<8x64xf32>
    %140 = math.tanh %139 : vector<8x64xf32>
    %cst_58 = arith.constant 1.000000e+00 : f32
    %141 = vector.broadcast %cst_58 : f32 to vector<8x64xf32>
    %142 = arith.addf %141, %140 : vector<8x64xf32>
    %143 = arith.mulf %132, %142 : vector<8x64xf32>
    %c0_59 = arith.constant 0 : index
    %c0_60 = arith.constant 0 : index
    %144 = vector.load %arg11[%c0_59, %c0_60] : memref<64x32xf32, #tpu.memory_space<vmem>>, vector<64x32xf32>
    %cst_61 = arith.constant dense<0.000000e+00> : vector<8x32xf32>
    %145 = tpu.matmul %143, %144, %cst_61 {dimension_numbers = #tpu.dot_dimension_numbers<[1], [0], [0], [1], [0, 0, 1, 1], [], []>} : vector<8x64xf32>, vector<64x32xf32>, vector<8x32xf32> -> vector<8x32xf32>
    %c0_62 = arith.constant 0 : index
    %c0_63 = arith.constant 0 : index
    %146 = vector.load %arg12[%c0_62, %c0_63] : memref<1x32xf32, #tpu.memory_space<vmem>>, vector<1x32xf32>
    %147 = vector.broadcast %146 : vector<1x32xf32> to vector<8x32xf32>
    %148 = arith.addf %145, %147 : vector<8x32xf32>
    %149 = arith.addf %148, %125 : vector<8x32xf32>
    %c0_64 = arith.constant 0 : index
    %c0_65 = arith.constant 0 : index
    %150 = vector.load %arg13[%c0_64, %c0_65] : memref<1x32xf32, #tpu.memory_space<vmem>>, vector<1x32xf32>
    %c0_66 = arith.constant 0 : index
    %c0_67 = arith.constant 0 : index
    %151 = vector.load %arg14[%c0_66, %c0_67] : memref<1x32xf32, #tpu.memory_space<vmem>>, vector<1x32xf32>
    %cst_68 = arith.constant dense<0.000000e+00> : vector<8xf32>
    %152 = vector.multi_reduction <add>, %149, %cst_68 [1] : vector<8x32xf32> to vector<8xf32>
    %153 = vector.shape_cast %152 : vector<8xf32> to vector<8x1xf32>
    %cst_69 = arith.constant 3.200000e+01 : f32
    %154 = vector.broadcast %cst_69 : f32 to vector<8x1xf32>
    %155 = arith.divf %153, %154 : vector<8x1xf32>
    %156 = vector.broadcast %155 : vector<8x1xf32> to vector<8x32xf32>
    %157 = arith.subf %149, %156 : vector<8x32xf32>
    %158 = arith.mulf %157, %157 : vector<8x32xf32>
    %cst_70 = arith.constant dense<0.000000e+00> : vector<8xf32>
    %159 = vector.multi_reduction <add>, %158, %cst_70 [1] : vector<8x32xf32> to vector<8xf32>
    %160 = vector.shape_cast %159 : vector<8xf32> to vector<8x1xf32>
    %cst_71 = arith.constant 3.200000e+01 : f32
    %161 = vector.broadcast %cst_71 : f32 to vector<8x1xf32>
    %162 = arith.divf %160, %161 : vector<8x1xf32>
    %163 = vector.broadcast %155 : vector<8x1xf32> to vector<8x32xf32>
    %164 = arith.subf %149, %163 : vector<8x32xf32>
    %cst_72 = arith.constant 9.99999996E-13 : f32
    %165 = vector.broadcast %cst_72 : f32 to vector<8x1xf32>
    %166 = arith.addf %162, %165 : vector<8x1xf32>
    %167 = math.rsqrt %166 : vector<8x1xf32>
    %168 = vector.broadcast %167 : vector<8x1xf32> to vector<8x32xf32>
    %169 = arith.mulf %164, %168 : vector<8x32xf32>
    %170 = vector.broadcast %150 : vector<1x32xf32> to vector<8x32xf32>
    %171 = arith.mulf %169, %170 : vector<8x32xf32>
    %172 = vector.broadcast %151 : vector<1x32xf32> to vector<8x32xf32>
    %173 = arith.addf %171, %172 : vector<8x32xf32>
    %c0_73 = arith.constant 0 : index
    %c0_74 = arith.constant 0 : index
    %c0_75 = arith.constant 0 : index
    %174 = vector.load %arg15[%c0_73, %c0_74, %c0_75] : memref<1x8x32xf32, #tpu.memory_space<vmem>>, vector<1x8x32xf32>
    %175 = vector.shape_cast %174 : vector<1x8x32xf32> to vector<8x32xf32>
    %176 = vector.shape_cast %173 : vector<8x32xf32> to vector<1x8x32xf32>
    tpu.vector_store %arg15[%c0_73, %c0_74, %c0_75], %176 {strides = array<i32>} : memref<1x8x32xf32, #tpu.memory_space<vmem>>, vector<1x8x32xf32>,
    return
  }
  func.func @transform_0(%arg0: i32) -> (i32, i32, i32) {
    %c0_i32 = arith.constant 0 : i32
    %c0_i32_0 = arith.constant 0 : i32
    %c0_i32_1 = arith.constant 0 : i32
    return %arg0, %c0_i32, %c0_i32_0 : i32, i32, i32
  }
  func.func @transform_1(%arg0: i32) -> (i32, i32, i32) {
    %c0_i32 = arith.constant 0 : i32
    %c0_i32_0 = arith.constant 0 : i32
    %c0_i32_1 = arith.constant 0 : i32
    return %arg0, %c0_i32, %c0_i32_0 : i32, i32, i32
  }
  func.func @transform_2(%arg0: i32) -> (i32, i32) {
    %c0_i32 = arith.constant 0 : i32
    %c0_i32_0 = arith.constant 0 : i32
    %c0_i32_1 = arith.constant 0 : i32
    return %c0_i32, %c0_i32_0 : i32, i32
  }
  func.func @transform_3(%arg0: i32) -> (i32, i32) {
    %c0_i32 = arith.constant 0 : i32
    %c0_i32_0 = arith.constant 0 : i32
    %c0_i32_1 = arith.constant 0 : i32
    return %c0_i32, %c0_i32_0 : i32, i32
  }
  func.func @transform_4(%arg0: i32) -> (i32, i32) {
    %c0_i32 = arith.constant 0 : i32
    %c0_i32_0 = arith.constant 0 : i32
    %c0_i32_1 = arith.constant 0 : i32
    return %c0_i32, %c0_i32_0 : i32, i32
  }
  func.func @transform_5(%arg0: i32) -> (i32, i32) {
    %c0_i32 = arith.constant 0 : i32
    %c0_i32_0 = arith.constant 0 : i32
    %c0_i32_1 = arith.constant 0 : i32
    return %c0_i32, %c0_i32_0 : i32, i32
  }
  func.func @transform_6(%arg0: i32) -> (i32, i32) {
    %c0_i32 = arith.constant 0 : i32
    %c0_i32_0 = arith.constant 0 : i32
    %c0_i32_1 = arith.constant 0 : i32
    return %c0_i32, %c0_i32_0 : i32, i32
  }
  func.func @transform_7(%arg0: i32) -> (i32, i32) {
    %c0_i32 = arith.constant 0 : i32
    %c0_i32_0 = arith.constant 0 : i32
    %c0_i32_1 = arith.constant 0 : i32
    return %c0_i32, %c0_i32_0 : i32, i32
  }
  func.func @transform_8(%arg0: i32) -> (i32, i32) {
    %c0_i32 = arith.constant 0 : i32
    %c0_i32_0 = arith.constant 0 : i32
    %c0_i32_1 = arith.constant 0 : i32
    return %c0_i32, %c0_i32_0 : i32, i32
  }
  func.func @transform_9(%arg0: i32) -> (i32, i32) {
    %c0_i32 = arith.constant 0 : i32
    %c0_i32_0 = arith.constant 0 : i32
    %c0_i32_1 = arith.constant 0 : i32
    return %c0_i32, %c0_i32_0 : i32, i32
  }
  func.func @transform_10(%arg0: i32) -> (i32, i32) {
    %c0_i32 = arith.constant 0 : i32
    %c0_i32_0 = arith.constant 0 : i32
    %c0_i32_1 = arith.constant 0 : i32
    return %c0_i32, %c0_i32_0 : i32, i32
  }
  func.func @transform_11(%arg0: i32) -> (i32, i32) {
    %c0_i32 = arith.constant 0 : i32
    %c0_i32_0 = arith.constant 0 : i32
    %c0_i32_1 = arith.constant 0 : i32
    return %c0_i32, %c0_i32_0 : i32, i32
  }
  func.func @transform_12(%arg0: i32) -> (i32, i32) {
    %c0_i32 = arith.constant 0 : i32
    %c0_i32_0 = arith.constant 0 : i32
    %c0_i32_1 = arith.constant 0 : i32
    return %c0_i32, %c0_i32_0 : i32, i32
  }
  func.func @transform_13(%arg0: i32) -> (i32, i32) {
    %c0_i32 = arith.constant 0 : i32
    %c0_i32_0 = arith.constant 0 : i32
    %c0_i32_1 = arith.constant 0 : i32
    return %c0_i32, %c0_i32_0 : i32, i32
  }
  func.func @transform_14(%arg0: i32) -> (i32, i32, i32) {
    %c0_i32 = arith.constant 0 : i32
    %c0_i32_0 = arith.constant 0 : i32
    %c0_i32_1 = arith.constant 0 : i32
    return %arg0, %c0_i32, %c0_i32_0 : i32, i32, i32
  }
}

</mosaic_0001>

<bundles_post_ra>
// kernel: aigt_classifier_forward.3
= control target key start
LH: loop header
LB: loop body
LE: loop exit
PB: predicated region body
PF: predicated region fallthrough
CT: control target
= control target key end

     0   :  { %vm25_vm0 = vcmask 261120   ;;  %v102_v8 = vmov 32.0   ;;  %s158_s0 = inlined_call_operand.vmem [shape: f32[2,8,32], index: 0, kind: input, shape index: {}]   ;;  %s159_s1 = inlined_call_operand.vmem [shape: f32[2,8,32], index: 1, kind: input, shape index: {}]   ;;  %s160_s2 = inlined_call_operand.vmem [shape: f32[1,1,32], index: 2, kind: input, shape index: {}]   ;;  %s161_s3 = inlined_call_operand.vmem [shape: f32[1,1,32], index: 3, kind: input, shape index: {}]   ;;  %s162_s4 = inlined_call_operand.vmem [shape: f32[2,8,32], index: 4, kind: output, shape index: {}]  }
   0x1   :  { %v17_v0 = vld [vmem:[%s158_s0] sm:$0xff]  ;;  %v18_v3 = vld [vmem:[%s158_s0 + $0x8] sm:$0xff]  ;;  %96 = vrcp.f32 %v102_v8 }
   0x2   :  { %v19_v1 = vld [vmem:[%s159_s1] sm:$0xff]  ;;  %v20_v4 = vld [vmem:[%s159_s1 + $0x8] sm:$0xff] }
   0x3   :  { %v21_v2 = vadd.f32 %v19_v1, %v17_v0  ;;  %v22_v6 = vadd.f32 %v20_v4, %v18_v3  ;;  %v94_v39 = vld [vmem:[%s160_s2] ss:$0 sm:$0xff] }
   0x4   :  { %v95_v42 = vld [vmem:[%s161_s3] ss:$0 sm:$0xff] }
   0x5   :  { %v26_v5 = vsel %vm25_vm0, %v21_v2, 0.0  ;;  %v29_v7 = vsel %vm25_vm0, %v22_v6, 0.0 }
   0x6   :  { %27 = vadd.xlane.f32.xlu0 %v26_v5 }
   0x7   :  { %v97_v9 = vpop.eup %96 }
   0x8   :  { %v33_v10 = vmul.f32 32.0, %v97_v9  ;;  %vm37_vm1 = vweird.f32 %v97_v9 }
   0xa   :  { %v34_v11 = vsub.f32 1.0, %v33_v10 }
   0xc   :  { %v35_v12 = vmul.f32 %v97_v9, %v34_v11 }
   0xe   :  { %30 = vadd.xlane.f32.xlu0 %v29_v7  ;;  %v36_v13 = vadd.f32 %v97_v9, %v35_v12 }
  0x10   :  { %v38_v14 = vsel %vm37_vm1, %v97_v9, %v36_v13 }
  0x79   :  { %v28_v15 = vpop.xlane.xlu0 %27 }
  0x7a   :  { %v39_v16 = vmul.f32 %v38_v14, %v28_v15 }
  0x7c   :  { %v41_v17 = vsub.f32 %v21_v2, %v39_v16 }
  0x7e   :  { %v43_v18 = vmul.f32 %v41_v17, %v41_v17 }
  0x80   :  { %v45_v19 = vsel %vm25_vm0, %v43_v18, 0.0 }
  0x81   :  { %46 = vadd.xlane.f32.xlu1 %v45_v19  ;;  %v31_v20 = vpop.xlane.xlu0 %30 }
  0x82   :  { %v40_v21 = vmul.f32 %v38_v14, %v31_v20 }
  0x84   :  { %v42_v22 = vsub.f32 %v22_v6, %v40_v21 }
  0x86   :  { %v44_v23 = vmul.f32 %v42_v22, %v42_v22 }
  0x88   :  { %v48_v24 = vsel %vm25_vm0, %v44_v23, 0.0 }
  0x89   :  { %49 = vadd.xlane.f32.xlu1 %v48_v24 }
  0xf4   :  { %v47_v25 = vpop.xlane.xlu1 %46 }
  0xf5   :  { %v51_v26 = vmul.f32 %v47_v25, %v38_v14 }
  0xf7   :  { %v53_v27 = vadd.f32 1e-12, %v51_v26 }
  0xf9   :  { %98 = vrsqrt.f32 %v53_v27  ;;  %vm61_vm3 = vweird.f32 %v53_v27 }
  0xfc   :  { %v50_v28 = vpop.xlane.xlu1 %49 }
  0xfd   :  { %v52_v29 = vmul.f32 %v50_v28, %v38_v14 }
  0xff   :  { %v99_v30 = vpop.eup %98  ;;  %v54_v31 = vadd.f32 1e-12, %v52_v29 }
 0x100   :  { %v56_v32 = vmul.f32 %v99_v30, %v53_v27  ;;  %vm62_vm2 = vweird.f32 %v99_v30 }
 0x101   :  { %100 = vrsqrt.f32 %v54_v31  ;;  %vm63_vm4 = vmor %vm61_vm3, %vm62_vm2  ;;  %vm71_vm6 = vweird.f32 %v54_v31 }
 0x102   :  { %v57_v33 = vmul.f32 %v99_v30, %v56_v32 }
 0x104   :  { %v58_v34 = vmul.f32 0.5, %v57_v33 }
 0x106   :  { %v59_v35 = vsub.f32 1.5, %v58_v34 }
 0x107   :  { %v101_v36 = vpop.eup %100 }
 0x108   :  { %v60_v37 = vmul.f32 %v99_v30, %v59_v35  ;;  %v66_v38 = vmul.f32 %v101_v36, %v54_v31  ;;  %vm72_vm5 = vweird.f32 %v101_v36 }
 0x109   :  { %vm73_vm7 = vmor %vm71_vm6, %vm72_vm5 }
 0x10a   :  { %v64_v40 = vsel %vm63_vm4, %v99_v30, %v60_v37  ;;  %v67_v41 = vmul.f32 %v101_v36, %v66_v38 }
 0x10b   :  { %v75_v43 = vmul.f32 %v64_v40, %v41_v17 }
 0x10c   :  { %v68_v44 = vmul.f32 0.5, %v67_v41 }
 0x10d   :  { %v80_v45 = vmul.f32 %v94_v39, %v75_v43 }
 0x10e   :  { %v69_v46 = vsub.f32 1.5, %v68_v44 }
 0x10f   :  { %v85_v47 = vadd.f32 %v95_v42, %v80_v45 }
 0x110   :  { %v70_v48 = vmul.f32 %v101_v36, %v69_v46 }
 0x111   :  { %87 = vst.msk [vmem:[%s162_s4] sm:$0xff] %vm25_vm0, %v85_v47 }
 0x112   :  { %v74_v49 = vsel %vm73_vm7, %v101_v36, %v70_v48 }
 0x113   :  { %v76_v50 = vmul.f32 %v74_v49, %v42_v22 }
 0x115   :  { %v81_v51 = vmul.f32 %v94_v39, %v76_v50 }
 0x117   :  { %v86_v52 = vadd.f32 %v95_v42, %v81_v51 }
 0x119   :  { %88 = vst.msk [vmem:[%s162_s4 + $0x8] sm:$0xff] %vm25_vm0, %v86_v52 }

// kernel: aigt_classifier_forward.4
= control target key start
LH: loop header
LB: loop body
LE: loop exit
PB: predicated region body
PF: predicated region fallthrough
CT: control target
= control target key end

     0   :  { %s1273_s29 = smov 0   ;;  %s1448_s0 = inlined_call_operand.vmem [shape: f32[2,8,32], index: 0, kind: input, shape index: {}]   ;;  %s1449_s1 = inlined_call_operand.vmem [shape: f32[2,1,8], index: 1, kind: input, shape index: {}]   ;;  %s1450_s2 = inlined_call_operand.vmem [shape: f32[32,96], index: 2, kind: input, shape index: {}]   ;;  %s1451_s3 = inlined_call_operand.vmem [shape: f32[1,96], index: 3, kind: input, shape index: {}]   ;;  %s1452_s4 = inlined_call_operand.vmem [shape: f32[32,32], index: 4, kind: input, shape index: {}]   ;;  %s1453_s5 = inlined_call_operand.vmem [shape: f32[1,32], index: 5, kind: input, shape index: {}]   ;;  %s1454_s6 = inlined_call_operand.vmem [shape: f32[1,32], index: 6, kind: input, shape index: {}]   ;;  %s1455_s7 = inlined_call_operand.vmem [shape: f32[1,32], index: 7, kind: input, shape index: {}]   ;;  %s1456_s8 = inlined_call_operand.vmem [shape: f32[32,64], index: 8, kind: input, shape index: {}]   ;;  %s1457_s9 = inlined_call_operand.vmem [shape: f32[1,64], index: 9, kind: input, shape index: {}]   ;;  %s1458_s10 = inlined_call_operand.vmem [shape: f32[64,32], index: 10, kind: input, shape index: {}]   ;;  %s1459_s11 = inlined_call_operand.vmem [shape: f32[1,32], index: 11, kind: input, shape index: {}]   ;;  %s1460_s12 = inlined_call_operand.vmem [shape: f32[1,32], index: 12, kind: input, shape index: {}]   ;;  %s1461_s13 = inlined_call_operand.vmem [shape: f32[1,32], index: 13, kind: input, shape index: {}]   ;;  %s1462_s14 = inlined_call_operand.vmem [shape: f32[2,8,32], index: 14, kind: output, shape index: {}]  }
   0x1 LB: > { %s1097_s30 = sadd.s32 4294967295, %s1184_s29   ;;  %p1101_p0 = scmp.ge.s32.totalorder %s1184_s29, 1  ;;  %s1184_s29 = sphi %s1273_s29, %s24_s29  }
   0x2   : > { %p419_p1 = scmp.lt.s32.totalorder %s1184_s29, 3 }
   0x4   : > { %p420_p2 = pnand %p1101_p0, %p419_p1 }
   0x5   : > { %p466_p3 = scmp.lt.s32.totalorder (!%p420_p2), %s1097_s30, 1  ;;  %s1186_s18 = smov (!%p420_p2), 88  }
   0x6   : > { %423 = sbr.rel (%p420_p2) target bundleno = 2281 (0x8e9), region = 76  ;;  %s1187_s19 = smov (!%p420_p2), 96  }
   0x7   : > { %s1188_s20 = smov (!%p420_p2), 120   ;;  %s1189_s21 = smov (!%p420_p2), 72  }
   0x8   : > { %s1190_s22 = smov (!%p420_p2), 104   ;;  %s1191_s24 = smov (!%p420_p2), 80  }
   0x9   : > { %s1193_s16 = smov (!%p420_p2), 112   ;;  %s1194_s17 = smov (!%p420_p2), 48  }
   0xb   : > { %v482_v0 = vld [vmem:[%s1450_s2 + $0x18] sm:$0xff]  ;;  %v481_v1 = vld [vmem:[%s1450_s2 + $0x10] sm:$0xff]  ;;  %v480_v2 = vld [vmem:[%s1450_s2 + $0x8] sm:$0xff]  ;;  %s1464_s30 = smov (!%p466_p3, %s1097_s30), 1  ;;  %vm487_vm0 = vcmask 261120   ;;  %vm514_vm1 = vcmask 64512  }
   0xc   : > { %503 = vmatpush.msra.mxu0 %v482_v0  ;;  %v479_v3 = vld [vmem:[%s1450_s2] sm:$0xff]  ;;  %s1102_s23 = sshll.u32 %s1464_s30, 3  ;;  %s472_s26 = scalar_lea.vmem %s1449_s1, %s1464_s30  ;;  %vm977_vm6 = vcmask 523264  }
   0xd   : > { %s469_s15 = scalar_lea.vmem %s1448_s0, %s1102_s23  ;;  %v1146_v5 = vld [vmem:[%s1451_s3] ss:$0 sm:$0xff] }
   0xe   : > { %504 = vmatpush.msra.mxu0 %v481_v1  ;;  %v1305_v4 = vld [vmem:[%s469_s15] sm:$0xff]  ;;  %s476_s15 = scalar_lea.vmem %s1462_s14, %s1102_s23 }
   0xf   : > { %v581_v8 = vld [vmem:[%s1452_s4] sm:$0xff] }
  0x10   : > { %505 = vmatpush.msra.mxu0 %v480_v2  ;;  %691 = vmatpush.msra.mxu3 %v581_v8  ;;  %v1145_v15 = vld [vmem:[%s472_s26] ss:$0 sm:$0xff]  ;;  %s1192_s26 = smov 64  }
  0x12   : > { %506 = vmatpush.msra.mxu0 %v479_v3 }
  0x13   : > { %1104 = vmatmul.msk.f32.vlgmr.msra.gmra.mxu0 %vm487_vm0, %v1305_v4 }
  0x90   : > { %v508_v6 = vpop.f32.mrf.mxu0 }
  0x91   : > { %v1312_v7 = vadd.f32 %v1146_v5, %v508_v6 }
  0x93   : > { %584 = vrot.lane.b32.xlu2 %v1312_v7, %s1186_s18  ;;  %512 = vrot.lane.b32.xlu0 %v1312_v7, %s1187_s19  ;;  %s1195_s18 = smov 56   ;;  %s1196_s19 = smov 40  }
  0x9b   : > { %582 = vrot.lane.b32.xlu2 %v1312_v7, %s1188_s20 }
  0xa3   : > { %790 = vrot.lane.b32.xlu2 %v1312_v7, %s1189_s21 }
  0xab   : > { %788 = vrot.lane.b32.xlu2 %v1312_v7, %s1190_s22 }
  0xb3   : > { %698 = vrot.lane.b32.xlu2 %v1312_v7, %s1191_s24 }
  0xed   : > { %v585_v9 = vpop.permute.xlu2 %584 }
  0xee   : > { %1108 = vmatpush.xpose.msk.msrb.mxu0 %vm514_vm1, %v585_v9  ;;  %v649_v9 = vld [vmem:[%s1452_s4 + $0x8] sm:$0xff] }
  0xf5   : > { %v583_v10 = vpop.permute.xlu2 %582 }
  0xf6   : > { %1109 = vmatmul.msk.f32.vlgmr.msrb.gmra.mxu0 %vm514_vm1, %v583_v10 }
  0xfd   : > { %v791_v11 = vpop.permute.xlu2 %790 }
  0xfe   : > { %1117 = vmatpush.xpose.msk.msrb.mxu3 %vm514_vm1, %v791_v11 }
 0x105   : > { %v789_v12 = vpop.permute.xlu2 %788  ;;  %v513_v13 = vpop.permute.xlu0 %512 }
 0x106   : > { %1105 = vmatpush.xpose.msk.msra.mxu1 %vm514_vm1, %v513_v13 }
 0x109   : > { %1106 = vmatmul.msk.f32.vlgmr.msra.gmra.mxu1 %vm514_vm1, %v1312_v7 }
 0x10a   : > { %668 = vmatpush.msrb.mxu1 %v649_v9 }
 0x10d   : > { %v699_v14 = vpop.permute.xlu2 %698 }
 0x10e   : > { %1113 = vmatpush.xpose.msk.msra.mxu0 %vm514_vm1, %v699_v14 }
 0x173   : > { %v607_v16 = vpop.f32.mrf.mxu0 }
 0x174   : > { %v610_v17 = vmul.f32 0.35355338, %v607_v16 }
 0x176   : > { %v611_v18 = vadd.f32 %v1145_v15, %v610_v17 }
 0x178   : > { %v612_v19 = vsel %vm514_vm1, %v611_v18, -inf }
 0x179   : > { %613 = vmax.xlane.f32.xlu2 %v612_v19 }
 0x186   : > { %v536_v20 = vpop.f32.mrf.mxu1 }
 0x187   : > { %v539_v21 = vmul.f32 0.35355338, %v536_v20 }
 0x189   : > { %v543_v22 = vadd.f32 %v1145_v15, %v539_v21 }
 0x18b   : > { %v544_v23 = vsel %vm514_vm1, %v543_v22, -inf }
 0x18c   : > { %545 = vmax.xlane.f32.xlu0 %v544_v23 }
 0x1ec   : > { %v614_v40 = vpop.xlane.xlu2 %613 }
 0x1ed   : > { %v615_v41 = vsub.f32 %v611_v18, %v614_v40  ;;  %v1147_v18 = vld [vmem:[%s1453_s5] ss:$0 sm:$0xff] }
 0x1ef   : > { %v616_v42 = vmul.f32 1.442695, %v615_v41 }
 0x1ff   : > { %v546_v24 = vpop.xlane.xlu0 %545 }
 0x200   : > { %v547_v25 = vsub.f32 %v543_v22, %v546_v24  ;;  %v1197_v24 = vmov 32.0  }
 0x202   : > { %v548_v26 = vmul.f32 1.442695, %v547_v25 }
 0x204   : > { %1154 = vpow2.f32 %v548_v26 }
 0x20a   : > { %v1155_v27 = vpop.eup %1154 }
 0x20b   : > { %v550_v28 = vsel %vm514_vm1, %v1155_v27, 0.0 }
 0x20c   : > { %551 = vadd.xlane.f32.xlu1 %v550_v28 }
 0x225   : > { %555 = vrot.lane.b32.xlu1 %v1312_v7, %s1192_s26 }
 0x22d   : > { %696 = vrot.lane.b32.xlu1 %v1312_v7, %s1193_s16 }
 0x27f   : > { %v552_v29 = vpop.xlane.xlu1 %551 }
 0x280   : > { %1156 = vrcp.f32 %v552_v29 }
 0x281   : > { %1158 = vpow2.f32 %v616_v42 }
 0x286   : > { %v1157_v30 = vpop.eup %1156 }
 0x287   : > { %v554_v32 = vmul.f32 %v1157_v30, %v1155_v27  ;;  %v1159_v50 = vpop.eup %1158 }
 0x288   : > { %v618_v51 = vsel %vm514_vm1, %v1159_v50, 0.0 }
 0x297   : > { %v556_v31 = vpop.permute.xlu1 %555 }
 0x298   : > { %576 = vmatpush.msra.mxu2 %v556_v31 }
 0x299   : > { %1107 = vmatmul.msk.f32.vlgmr.msra.gmra.mxu2 %vm514_vm1, %v554_v32 }
 0x29f   : > { %v697_v33 = vpop.permute.xlu1 %696 }
 0x2a0   : > { %1114 = vmatmul.msk.f32.vlgmr.msra.gmra.mxu0 %vm514_vm1, %v697_v33 }
 0x31c   : > { %v578_v34 = vpop.f32.mrf.mxu2 }
 0x31d   : > { %1112 = vmatmul.msk.f32.vlgmr.msra.gmra.mxu3 %vm514_vm1, %v578_v34  ;;  %v721_v35 = vpop.f32.mrf.mxu0 }
 0x31e   : > { %v724_v36 = vmul.f32 0.35355338, %v721_v35  ;;  %v928_v35 = vld [vmem:[%s1456_s8 + $0x18] sm:$0xff] }
 0x320   : > { %v725_v37 = vadd.f32 %v1145_v15, %v724_v36  ;;  %v927_v36 = vld [vmem:[%s1456_s8 + $0x10] sm:$0xff] }
 0x322   : > { %v726_v38 = vsel %vm514_vm1, %v725_v37, -inf }
 0x323   : > { %727 = vmax.xlane.f32.xlu1 %v726_v38  ;;  %v925_v38 = vld [vmem:[%s1456_s8] sm:$0xff] }
 0x325   : > { %1118 = vmatmul.msk.f32.vlgmr.msrb.gmra.mxu3 %vm514_vm1, %v789_v12  ;;  %v855_v12 = vld [vmem:[%s1452_s4 + $0x18] sm:$0xff] }
 0x33c   : > { %737 = vrot.lane.b32.xlu1 %v1312_v7, %s1194_s17 }
 0x396   : > { %v728_v44 = vpop.xlane.xlu1 %727 }
 0x397   : > { %v729_v47 = vsub.f32 %v725_v37, %v728_v44  ;;  %v926_v37 = vld [vmem:[%s1456_s8 + $0x8] sm:$0xff] }
 0x399   : > { %v730_v49 = vmul.f32 1.442695, %v729_v47 }
 0x39b   : > { %1160 = vpow2.f32 %v730_v49 }
 0x3a0   : > { %v1346_v39 = vpop.f32.mrf.mxu3 }
 0x3a1   : > { %v1161_v52 = vpop.eup %1160 }
 0x3a2   : > { %v732_v53 = vsel %vm514_vm1, %v1161_v52, 0.0 }
 0x3a8   : > { %v813_v43 = vpop.f32.mrf.mxu3 }
 0x3a9   : > { %v816_v45 = vmul.f32 0.35355338, %v813_v43 }
 0x3ab   : > { %v817_v46 = vadd.f32 %v1145_v15, %v816_v45 }
 0x3ad   : > { %v818_v48 = vsel %vm514_vm1, %v817_v46, -inf }
 0x3ae   : > { %819 = vmax.xlane.f32.xlu0 %v818_v48  ;;  %v738_v0 = vpop.permute.xlu1 %737  ;;  %v1148_v48 = vld [vmem:[%s1454_s6] ss:$0 sm:$0xff] }
 0x3b6   : > { %619 = vadd.xlane.f32.xlu0 %v618_v51  ;;  %v1149_v51 = vld [vmem:[%s1455_s7] ss:$0 sm:$0xff] }
 0x3be   : > { %733 = vadd.xlane.f32.xlu0 %v732_v53 }
 0x3d2   : > { %623 = vrot.lane.b32.xlu0 %v1312_v7, %s1195_s18 }
 0x421   : > { %v820_v54 = vpop.xlane.xlu0 %819 }
 0x422   : > { %v821_v55 = vsub.f32 %v817_v46, %v820_v54  ;;  %v972_v54 = vld [vmem:[%s1458_s10 + $0x38] sm:$0xff] }
 0x423   : > { %989 = vmatpush.msra.mxu3 %v972_v54 }
 0x424   : > { %v822_v56 = vmul.f32 1.442695, %v821_v55  ;;  %v971_v55 = vld [vmem:[%s1458_s10 + $0x30] sm:$0xff] }
 0x425   : > { %990 = vmatpush.msra.mxu3 %v971_v55 }
 0x426   : > { %1162 = vpow2.f32 %v822_v56  ;;  %v970_v56 = vld [vmem:[%s1458_s10 + $0x28] sm:$0xff] }
 0x427   : > { %991 = vmatpush.msra.mxu3 %v970_v56 }
 0x429   : > { %v620_v59 = vpop.xlane.xlu0 %619 }
 0x42a   : > { %1164 = vrcp.f32 %v620_v59  ;;  %v967_v59 = vld [vmem:[%s1458_s10 + $0x10] sm:$0xff] }
 0x42c   : > { %v1163_v57 = vpop.eup %1162 }
 0x42d   : > { %v824_v58 = vsel %vm514_vm1, %v1163_v57, 0.0 }
 0x42e   : > { %825 = vadd.xlane.f32.xlu2 %v824_v58  ;;  %v968_v58 = vld [vmem:[%s1458_s10 + $0x18] sm:$0xff] }
 0x430   : > { %v1165_v61 = vpop.eup %1164 }
 0x431   : > { %v734_v60 = vpop.xlane.xlu0 %733  ;;  %v622_v63 = vmul.f32 %v1165_v61, %v1159_v50  ;;  %v965_v61 = vld [vmem:[%s1458_s10] sm:$0xff] }
 0x432   : > { %1166 = vrcp.f32 %v734_v60  ;;  %v966_v60 = vld [vmem:[%s1458_s10 + $0x8] sm:$0xff] }
 0x438   : > { %v1167_v1 = vpop.eup %1166 }
 0x439   : > { %v736_v2 = vmul.f32 %v1167_v1, %v1161_v52 }
 0x444   : > { %v624_v62 = vpop.permute.xlu0 %623 }
 0x445   : > { %644 = vmatpush.msrb.mxu2 %v624_v62  ;;  %v1150_v62 = vld [vmem:[%s1457_s9] ss:$0 sm:$0xff] }
 0x446   : > { %829 = vrot.lane.b32.xlu2 %v1312_v7, %s1196_s19  ;;  %1110 = vmatmul.msk.f32.vlgmr.msrb.gmra.mxu2 %vm514_vm1, %v622_v63  ;;  %v763_v7 = vld [vmem:[%s1452_s4 + $0x10] sm:$0xff] }
 0x447   : > { %758 = vmatpush.msra.mxu2 %v738_v0  ;;  %782 = vmatpush.msra.mxu1 %v763_v7 }
 0x449   : > { %874 = vmatpush.msrb.mxu2 %v855_v12 }
 0x44e   : > { %1115 = vmatmul.msk.f32.vlgmr.msra.gmra.mxu2 %vm514_vm1, %v736_v2 }
 0x4a1   : > { %v826_v3 = vpop.xlane.xlu2 %825 }
 0x4a2   : > { %1168 = vrcp.f32 %v826_v3 }
 0x4a3   : > { %1170 = vrcp.f32 %v1197_v24 }
 0x4a8   : > { %v1169_v5 = vpop.eup %1168 }
 0x4a9   : > { %v828_v6 = vmul.f32 %v1169_v5, %v1163_v57  ;;  %v830_v8 = vpop.permute.xlu2 %829  ;;  %v1171_v25 = vpop.eup %1170  ;;  %v969_v57 = vld [vmem:[%s1458_s10 + $0x20] sm:$0xff] }
 0x4aa   : > { %850 = vmatpush.msrb.mxu0 %v830_v8  ;;  %v892_v26 = vmul.f32 32.0, %v1171_v25  ;;  %vm896_vm2 = vweird.f32 %v1171_v25  ;;  %992 = vmatpush.msra.mxu3 %v969_v57 }
 0x4ab   : > { %1119 = vmatmul.msk.f32.vlgmr.msrb.gmra.mxu0 %vm514_vm1, %v828_v6 }
 0x4ac   : > { %v893_v27 = vsub.f32 1.0, %v892_v26  ;;  %993 = vmatpush.msra.mxu3 %v968_v58 }
 0x4ae   : > { %v894_v28 = vmul.f32 %v1171_v25, %v893_v27  ;;  %994 = vmatpush.msra.mxu3 %v967_v59 }
 0x4b0   : > { %v895_v29 = vadd.f32 %v1171_v25, %v894_v28  ;;  %995 = vmatpush.msra.mxu3 %v966_v60 }
 0x4b2   : > { %v1375_v30 = vsel %vm896_vm2, %v1171_v25, %v895_v29  ;;  %996 = vmatpush.msra.mxu3 %v965_v61 }
 0x4c9   : > { %v646_v10 = vpop.f32.mrf.mxu2 }
 0x4ca   : > { %1111 = vmatmul.msk.f32.vlgmr.msrb.gmra.mxu1 %vm514_vm1, %v646_v10 }
 0x4cb   : > { %948 = vmatpush.msrb.mxu1 %v928_v35 }
 0x4cd   : > { %949 = vmatpush.msrb.mxu1 %v927_v36 }
 0x4cf   : > { %950 = vmatpush.msrb.mxu1 %v926_v37 }
 0x4d1   : > { %v760_v11 = vpop.f32.mrf.mxu2  ;;  %951 = vmatpush.msrb.mxu1 %v925_v38 }
 0x4d2   : > { %1116 = vmatmul.msk.f32.vlgmr.msra.gmra.mxu1 %vm514_vm1, %v760_v11  ;;  %v1151_v11 = vld [vmem:[%s1459_s11] ss:$0 sm:$0xff] }
 0x528   : > { %v852_v13 = vpop.f32.mrf.mxu0 }
 0x529   : > { %1120 = vmatmul.msk.f32.vlgmr.msrb.gmra.mxu2 %vm514_vm1, %v852_v13 }
 0x547   : > { %v670_v14 = vpop.f32.mrf.mxu1 }
 0x548   : > { %v694_v16 = vadd.f32 %v1346_v39, %v670_v14 }
 0x54f   : > { %v784_v15 = vpop.f32.mrf.mxu1 }
 0x550   : > { %v787_v17 = vadd.f32 %v784_v15, %v694_v16 }
 0x5ac   : > { %v876_v19 = vpop.f32.mrf.mxu2 }
 0x5ad   : > { %v879_v20 = vadd.f32 %v876_v19, %v787_v17 }
 0x5af   : > { %v884_v21 = vadd.f32 %v1147_v18, %v879_v20 }
 0x5b1   : > { %v885_v22 = vadd.f32 %v884_v21, %v1305_v4 }
 0x5b3   : > { %v888_v23 = vsel %vm487_vm0, %v885_v22, 0.0 }
 0x5b4   : > { %889 = vadd.xlane.f32.xlu0 %v888_v23 }
 0x627   : > { %v890_v31 = vpop.xlane.xlu0 %889 }
 0x628   : > { %v898_v32 = vmul.f32 %v1375_v30, %v890_v31  ;;  %v1152_v31 = vld [vmem:[%s1460_s12] ss:$0 sm:$0xff] }
 0x62a   : > { %v899_v33 = vsub.f32 %v885_v22, %v898_v32 }
 0x62c   : > { %v900_v34 = vmul.f32 %v899_v33, %v899_v33 }
 0x62e   : > { %v901_v4 = vsel %vm487_vm0, %v900_v34, 0.0 }
 0x62f   : > { %902 = vadd.xlane.f32.xlu1 %v901_v4 }
 0x6a2   : > { %v903_v39 = vpop.xlane.xlu1 %902 }
 0x6a3   : > { %v904_v40 = vmul.f32 %v903_v39, %v1375_v30 }
 0x6a5   : > { %v905_v41 = vadd.f32 1e-12, %v904_v40 }
 0x6a7   : > { %1172 = vrsqrt.f32 %v905_v41  ;;  %vm912_vm4 = vweird.f32 %v905_v41 }
 0x6ad   : > { %v1173_v42 = vpop.eup %1172 }
 0x6ae   : > { %v907_v43 = vmul.f32 %v1173_v42, %v905_v41  ;;  %vm913_vm3 = vweird.f32 %v1173_v42 }
 0x6af   : > { %vm914_vm5 = vmor %vm912_vm4, %vm913_vm3 }
 0x6b0   : > { %v908_v44 = vmul.f32 %v1173_v42, %v907_v43 }
 0x6b2   : > { %v909_v45 = vmul.f32 0.5, %v908_v44 }
 0x6b4   : > { %v910_v46 = vsub.f32 1.5, %v909_v45 }
 0x6b6   : > { %v911_v47 = vmul.f32 %v1173_v42, %v910_v46 }
 0x6b8   : > { %v915_v49 = vsel %vm914_vm5, %v1173_v42, %v911_v47 }
 0x6b9   : > { %v916_v50 = vmul.f32 %v915_v49, %v899_v33 }
 0x6bb   : > { %v920_v52 = vmul.f32 %v1148_v48, %v916_v50 }
 0x6bd   : > { %v924_v53 = vadd.f32 %v1149_v51, %v920_v52 }
 0x6bf   : > { %1121 = vmatmul.msk.f32.vlgmr.msrb.gmra.mxu1 %vm487_vm0, %v924_v53 }
 0x73c   : > { %v953_v63 = vpop.f32.mrf.mxu1 }
 0x73d   : > { %v954_v0 = vadd.f32 %v1150_v62, %v953_v63 }
 0x73f   : > { %v957_v1 = vmul.f32 0.044715, %v954_v0  ;;  %v956_v9 = vmul.f32 0.5, %v954_v0 }
 0x741   : > { %v958_v2 = vmul.f32 %v957_v1, %v954_v0 }
 0x743   : > { %v959_v3 = vmul.f32 %v958_v2, %v954_v0 }
 0x745   : > { %v960_v5 = vadd.f32 %v959_v3, %v954_v0 }
 0x747   : > { %v961_v6 = vmul.f32 0.7978846, %v960_v5 }
 0x749   : > { %1174 = vtanh.f32 %v961_v6 }
 0x74f   : > { %v1175_v8 = vpop.eup %1174 }
 0x750   : > { %v963_v7 = vadd.f32 1.0, %v1175_v8 }
 0x752   : > { %v964_v10 = vmul.f32 %v963_v7, %v956_v9 }
 0x754   : > { %1122 = vmatmul.msk.f32.vlgmr.msra.gmra.mxu3 %vm977_vm6, %v964_v10 }
 0x7d7   : > { %v998_v12 = vpop.f32.mrf.mxu3 }
 0x7d8   : > { %v999_v13 = vadd.f32 %v1151_v11, %v998_v12 }
 0x7da   : > { %v1001_v14 = vadd.f32 %v999_v13, %v924_v53 }
 0x7dc   : > { %v1004_v15 = vsel %vm487_vm0, %v1001_v14, 0.0 }
 0x7dd   : > { %1005 = vadd.xlane.f32.xlu2 %v1004_v15 }
 0x850   : > { %v1006_v16 = vpop.xlane.xlu2 %1005 }
 0x851   : > { %v1007_v17 = vmul.f32 %v1006_v16, %v1375_v30 }
 0x853   : > { %v1008_v18 = vsub.f32 %v1001_v14, %v1007_v17 }
 0x855   : > { %v1009_v19 = vmul.f32 %v1008_v18, %v1008_v18 }
 0x857   : > { %v1010_v20 = vsel %vm487_vm0, %v1009_v19, 0.0 }
 0x858   : > { %1011 = vadd.xlane.f32.xlu0 %v1010_v20 }
 0x8cb   : > { %v1012_v21 = vpop.xlane.xlu0 %1011 }
 0x8cc   : > { %v1013_v22 = vmul.f32 %v1012_v21, %v1375_v30  ;;  %v1153_v30 = vld [vmem:[%s1461_s13] ss:$0 sm:$0xff] }
 0x8ce   : > { %v1014_v23 = vadd.f32 1e-12, %v1013_v22 }
 0x8d0   : > { %1176 = vrsqrt.f32 %v1014_v23  ;;  %vm1021_vm8 = vweird.f32 %v1014_v23 }
 0x8d6   : > { %v1177_v24 = vpop.eup %1176 }
 0x8d7   : > { %v1016_v25 = vmul.f32 %v1177_v24, %v1014_v23  ;;  %vm1022_vm7 = vweird.f32 %v1177_v24 }
 0x8d8   : > { %vm1023_vm9 = vmor %vm1021_vm8, %vm1022_vm7 }
 0x8d9   : > { %v1017_v26 = vmul.f32 %v1177_v24, %v1016_v25 }
 0x8db   : > { %v1018_v27 = vmul.f32 0.5, %v1017_v26 }
 0x8dd   : > { %v1019_v28 = vsub.f32 1.5, %v1018_v27 }
 0x8df   : > { %v1020_v29 = vmul.f32 %v1177_v24, %v1019_v28 }
 0x8e1   : > { %v1024_v32 = vsel %vm1023_vm9, %v1177_v24, %v1020_v29 }
 0x8e2   : > { %v1025_v33 = vmul.f32 %v1024_v32, %v1008_v18 }
 0x8e4   : > { %v1029_v34 = vmul.f32 %v1152_v31, %v1025_v33 }
 0x8e6   : > { %v1033_v4 = vadd.f32 %v1153_v30, %v1029_v34 }
 0x8e8   : > { %1034 = vst.msk [vmem:[%s476_s15] sm:$0xff] %vm487_vm0, %v1033_v4 }
 0x8e9 PF: > { %s24_s29 = sadd.s32 1, %s1184_s29  }
 0x8ea   : > { %p21_p4 = scmp.ge.s32.totalorder %s24_s29, 4  }
 0x8ec   :  { %23 = sbr.rel (!%p21_p4) target bundleno = 1 (0x1), region = 109 }

</bundles_post_ra>
